<compile_context>
chip_gen: v5e
topology: v5e:2x2
jax: 0.10.0
libtpu: 0.0.40
codegen_flags: <defaults>
</compile_context>

<pallas_src>
import jax
import jax.numpy as jnp
from jax.experimental import pallas as pl
from jax.experimental.pallas import tpu as pltpu


_LANE = 128        # vreg lane width (fast / last axis)
_SUBLANE = 8       # vreg sublane count (second-to-last axis)
_MAX_TILE_ROWS = 2048   # 2048*128*4B = 1 MiB per f32 buffer per tile


def _identity_kernel(x_ref, o_ref):
    # Pure copy: one lane-dense VMEM tile in, same tile out, dtype preserved.
    o_ref[...] = x_ref[...]


@jax.jit
def pallas_identity(x):
    """y = x, streamed through a tiled Pallas TPU copy kernel (any shape/dtype)."""
    orig_shape = x.shape
    orig_dtype = x.dtype
    total = x.size

    if total == 0:  # static under jit (shape-dependent)
        return x

    flat = x.reshape(-1)

    # Pad to a whole number of (8, 128) vreg tiles so the 2-D view is aligned,
    # then pick the row-tile size and pad rows to a multiple of it so every
    # grid step handles a full, unmasked tile.
    vreg_elems = _SUBLANE * _LANE
    padded_total = ((total + vreg_elems - 1) // vreg_elems) * vreg_elems
    rows = padded_total // _LANE
    tile_rows = min(rows, _MAX_TILE_ROWS)          # multiple of 8 by construction
    rows_padded = ((rows + tile_rows - 1) // tile_rows) * tile_rows
    pad_elems = rows_padded * _LANE - total
    if pad_elems:
        flat = jnp.pad(flat, (0, pad_elems))
    x2 = flat.reshape(rows_padded, _LANE)

    grid = (rows_padded // tile_rows,)

    y2 = pl.pallas_call(
        _identity_kernel,
        out_shape=jax.ShapeDtypeStruct((rows_padded, _LANE), orig_dtype),
        grid=grid,
        in_specs=[pl.BlockSpec((tile_rows, _LANE), lambda i: (i, 0))],
        out_specs=pl.BlockSpec((tile_rows, _LANE), lambda i: (i, 0)),
        compiler_params=pltpu.CompilerParams(
            dimension_semantics=("parallel",),
        ),
    )(x2)

    return y2.reshape(-1)[:total].reshape(orig_shape)


if __name__ == "__main__":
    key = jax.random.PRNGKey(0)
    # Small shape consistent with the module (Identity accepts anything).
    x = jax.random.normal(key, (2, 4, 16, 16), jnp.float32)

    y = pallas_identity(x)
    y = jax.block_until_ready(y)

    assert y.shape == x.shape, (y.shape, x.shape)
    assert y.dtype == x.dtype, (y.dtype, x.dtype)
    assert bool(jnp.all(y == x)), "identity output does not match input"
    print("KERNEL_OK")
</pallas_src>

<mosaic_0001>
module attributes {stable_mosaic.version = 11 : i64} {
  func.func @_identity_kernel(%arg0: i32, %arg1: memref<16x128xf32, #tpu.memory_space<vmem>>, %arg2: memref<16x128xf32, #tpu.memory_space<vmem>>) attributes {dimension_semantics = [#tpu.dimension_semantics<parallel>], iteration_bounds = array<i64: 1>, scalar_prefetch = 0 : i64, scratch_operands = 0 : i64, tpu.core_type = #tpu.core_type<tc>, window_params = [{transform_indices = @transform_0, window_bounds = array<i64: 16, 128>}, {transform_indices = @transform_1, window_bounds = array<i64: 16, 128>}]} {
    %c0 = arith.constant 0 : index
    %c0_0 = arith.constant 0 : index
    %0 = vector.load %arg1[%c0, %c0_0] : memref<16x128xf32, #tpu.memory_space<vmem>>, vector<16x128xf32>
    %c0_1 = arith.constant 0 : index
    %c0_2 = arith.constant 0 : index
    %1 = vector.load %arg2[%c0_1, %c0_2] : memref<16x128xf32, #tpu.memory_space<vmem>>, vector<16x128xf32>
    tpu.vector_store %arg2[%c0_1, %c0_2], %0 {strides = array<i32>} : memref<16x128xf32, #tpu.memory_space<vmem>>, vector<16x128xf32>,
    return
  }
  func.func @transform_0(%arg0: i32) -> (i32, i32) {
    %c0_i32 = arith.constant 0 : i32
    %c0_i32_0 = arith.constant 0 : i32
    return %arg0, %c0_i32 : i32, i32
  }
  func.func @transform_1(%arg0: i32) -> (i32, i32) {
    %c0_i32 = arith.constant 0 : i32
    %c0_i32_0 = arith.constant 0 : i32
    return %arg0, %c0_i32 : i32, i32
  }
}

</mosaic_0001>

<bundles_post_ra>
// kernel: pallas_identity.1
= control target key start
LH: loop header
LB: loop body
LE: loop exit
PB: predicated region body
PF: predicated region fallthrough
CT: control target
= control target key end

     0   :  { %s38_s0 = inlined_call_operand.vmem [shape: f32[16,128], index: 0, kind: input, shape index: {}]   ;;  %s39_s1 = inlined_call_operand.vmem [shape: f32[16,128], index: 1, kind: output, shape index: {}]  }
   0x1   :  { %v8_v0 = vld [vmem:[%s38_s0] sm:$0xff]  ;;  %v9_v1 = vld [vmem:[%s38_s0 + $0x8] sm:$0xff] }
   0x2   :  { %10 = vst [vmem:[%s39_s1] sm:$0xff] %v8_v0 }
   0x3   :  { %11 = vst [vmem:[%s39_s1 + $0x8] sm:$0xff] %v9_v1 }

</bundles_post_ra>
